<compile_context>
chip_gen: v7x
topology: tpu7x:2x2x1
jax: 0.10.0
libtpu: 0.0.40
codegen_flags: <defaults>
</compile_context>

<pallas_src>
import functools

import jax
import jax.numpy as jnp
from jax.experimental import pallas as pl
from jax.experimental.pallas import tpu as pltpu

_LANE = 128


def _round_up(x, m):
    return ((x + m - 1) // m) * m


# ----------------------------------------------------------------------------
# Pallas kernel: fused MLP decoder (all linear layers + activations in-kernel)
# ----------------------------------------------------------------------------
def _make_decoder_kernel(num_layers, relu_flags):
    """Build a kernel computing a chain of (x @ W + b) [+ ReLU] layers.

    Refs layout: (x_ref, w0, b0, w1, b1, ..., w{n-1}, b{n-1}, o_ref)
    x / W are bf16 (MXU operands), biases f32, accumulation in f32.
    """

    def kernel(*refs):
        x_ref = refs[0]
        o_ref = refs[-1]
        h = x_ref[...]  # bf16 MXU operand
        for li in range(num_layers):
            w_ref = refs[1 + 2 * li]
            b_ref = refs[2 + 2 * li]
            # MXU matmul with f32 accumulate; bias add + ReLU on VPU in f32.
            acc = jnp.dot(h, w_ref[...], preferred_element_type=jnp.float32)
            acc = acc + b_ref[...]
            if relu_flags[li]:
                acc = jnp.maximum(acc, 0.0)
            if li < num_layers - 1:
                h = acc.astype(jnp.bfloat16)  # feed next MXU matmul as bf16
            else:
                h = acc
        o_ref[...] = h.astype(o_ref.dtype)

    return kernel


def decoder_forward(x, kernel_params, *, block_batch=256):
    """Run the decoder.

    x:             [B, latent]  float32
    kernel_params: list of (W_bf16 (in_pad, out_pad), b_f32 (1, out_pad));
                   final layer's out_pad == D (already a lane multiple here).
    returns [B, D] float32
    """
    num_layers = len(kernel_params)
    relu_flags = [True] * (num_layers - 1) + [False]

    B, F_in = x.shape
    D = kernel_params[-1][0].shape[1]

    # Pick a batch tile: fill the MXU rows but don't over-allocate for tiny B.
    tb = min(block_batch, _round_up(B, 8))
    b_pad = _round_up(B, tb)
    x_bf16 = x.astype(jnp.bfloat16)
    if b_pad != B:
        x_bf16 = jnp.pad(x_bf16, ((0, b_pad - B), (0, 0)))

    kernel = _make_decoder_kernel(num_layers, relu_flags)

    flat_inputs = [x_bf16]
    in_specs = [pl.BlockSpec((tb, F_in), lambda i: (i, 0))]  # streamed per step
    for (w, b) in kernel_params:
        flat_inputs.append(w)
        in_specs.append(pl.BlockSpec(w.shape, lambda i: (0, 0)))  # VMEM-resident
        flat_inputs.append(b)
        in_specs.append(pl.BlockSpec(b.shape, lambda i: (0, 0)))  # VMEM-resident

    out = pl.pallas_call(
        kernel,
        out_shape=jax.ShapeDtypeStruct((b_pad, D), jnp.float32),
        grid=(b_pad // tb,),
        in_specs=in_specs,
        out_specs=pl.BlockSpec((tb, D), lambda i: (i, 0)),
        compiler_params=pltpu.CompilerParams(
            dimension_semantics=("parallel",)  # megacore sharding on v7x
        ),
    )(*flat_inputs)

    if b_pad != B:
        out = out[:B]
    return out


# ----------------------------------------------------------------------------
# Parameter construction (deterministic, mirrors nn.Linear shapes)
# ----------------------------------------------------------------------------
def init_decoder_params(key, layers, D):
    """Build the decoder layer chain exactly as the PyTorch __init__ does.

    layers = [L0, L1, ..., Lk], latent dim = layers[-1], output dim = D.
    Layer order of execution:
        Linear(Lk -> L(k-1)), ..., Linear(L1 -> L0), Linear(L0 -> D)
    Returns list of (W_in_out, b_1_out) f32, exact (unpadded) shapes,
    in execution order.
    """
    dims = []
    rev = list(layers)
    for i in range(len(rev) - 1, 0, -1):
        dims.append((rev[i], rev[i - 1]))   # Linear(layers[i] -> layers[i-1])
    dims.append((rev[0], D))                # Linear(layers[0] -> D)

    params = []
    for (fan_in, fan_out) in dims:
        key, kw, kb = jax.random.split(key, 3)
        bound = 1.0 / jnp.sqrt(jnp.float32(fan_in))
        # PyTorch stores W as (out, in); we keep the transposed (in, out) layout.
        w = jax.random.uniform(kw, (fan_in, fan_out), jnp.float32, -bound, bound)
        b = jax.random.uniform(kb, (1, fan_out), jnp.float32, -bound, bound)
        params.append((w, b))
    return params


def pad_params_for_kernel(params):
    """Zero-pad intermediate feature widths up to the 128-lane width and cast
    weights to bf16 (MXU operands).  Biases stay f32 for the VPU add.

    The network input width (latent) and the final output width D are left
    untouched; zero rows/cols make the padded math bit-identical (ReLU(0)=0).
    """
    num_layers = len(params)
    padded = []
    prev_out_pad = params[0][0].shape[0]  # latent width, not padded
    for li, (w, b) in enumerate(params):
        fan_in, fan_out = w.shape
        in_pad = prev_out_pad
        out_pad = fan_out if li == num_layers - 1 else _round_up(fan_out, _LANE)
        w_p = jnp.zeros((in_pad, out_pad), jnp.float32)
        w_p = w_p.at[:fan_in, :fan_out].set(w)
        b_p = jnp.zeros((1, out_pad), jnp.float32)
        b_p = b_p.at[:, :fan_out].set(b)
        padded.append((w_p.astype(jnp.bfloat16), b_p))
        prev_out_pad = out_pad
    return padded


# Pure-JAX f32 reference for correctness checking (unpadded params).
def decoder_ref(x, params):
    h = x
    for li, (w, b) in enumerate(params):
        h = h @ w + b
        if li < len(params) - 1:
            h = jnp.maximum(h, 0.0)
    return h


class DecoderPallas:
    """Thin wrapper mirroring the PyTorch module's forward(X, sparse)."""

    def __init__(self, layers, D, key):
        self.layers = layers
        self.D = D
        self.params = init_decoder_params(key, layers, D)      # f32 reference params
        self.kernel_params = pad_params_for_kernel(self.params)  # bf16, lane-padded

    def forward(self, X, sparse=None):
        # `sparse` is unused in the reference module's forward as well.
        return decoder_forward(X, self.kernel_params)


if __name__ == "__main__":
    # Small shapes consistent with the module:
    #   layers = [64, 32, 16]  (latent dim = 16), D = 128, batch = 256
    # batch=256 with a 128-row tile exercises the streaming grid (2 steps)
    # while keeping every array tiny.
    layers = [64, 32, 16]
    D = 128
    batch = 256

    key = jax.random.PRNGKey(0)
    key_params, key_x = jax.random.split(key)

    dec = DecoderPallas(layers, D, key_params)

    x = jax.random.normal(key_x, (batch, layers[-1]), jnp.float32)
    sparse = None  # unused, matches PyTorch forward signature

    out = dec.forward(x, sparse)
    out = jax.block_until_ready(out)

    # Verify against pure-JAX f32 reference (bf16 MXU operands => loose tol).
    ref = decoder_ref(x, dec.params)
    assert out.shape == (batch, D), out.shape
    assert jnp.allclose(out, ref, atol=2e-2, rtol=2e-2), (
        "mismatch vs reference: max abs err = "
        f"{float(jnp.max(jnp.abs(out - ref)))}"
    )

    print("KERNEL_OK")
</pallas_src>

<mosaic_0001>
module attributes {stable_mosaic.version = 11 : i64} {
  func.func @kernel(%arg0: i32, %arg1: memref<256x16xbf16, #tpu.memory_space<vmem>>, %arg2: memref<16x128xbf16, #tpu.memory_space<vmem>>, %arg3: memref<1x128xf32, #tpu.memory_space<vmem>>, %arg4: memref<128x128xbf16, #tpu.memory_space<vmem>>, %arg5: memref<1x128xf32, #tpu.memory_space<vmem>>, %arg6: memref<128x128xbf16, #tpu.memory_space<vmem>>, %arg7: memref<1x128xf32, #tpu.memory_space<vmem>>, %arg8: memref<256x128xf32, #tpu.memory_space<vmem>>) attributes {dimension_semantics = [#tpu.dimension_semantics<parallel>], iteration_bounds = array<i64: 1>, scalar_prefetch = 0 : i64, scratch_operands = 0 : i64, tpu.core_type = #tpu.core_type<tc>, window_params = [{transform_indices = @transform_0, window_bounds = array<i64: 256, 16>}, {pipeline_mode = #tpu.pipeline_mode<synchronous>, transform_indices = @transform_1, window_bounds = array<i64: 16, 128>}, {pipeline_mode = #tpu.pipeline_mode<synchronous>, transform_indices = @transform_2, window_bounds = array<i64: 1, 128>}, {pipeline_mode = #tpu.pipeline_mode<synchronous>, transform_indices = @transform_3, window_bounds = array<i64: 128, 128>}, {pipeline_mode = #tpu.pipeline_mode<synchronous>, transform_indices = @transform_4, window_bounds = array<i64: 1, 128>}, {pipeline_mode = #tpu.pipeline_mode<synchronous>, transform_indices = @transform_5, window_bounds = array<i64: 128, 128>}, {pipeline_mode = #tpu.pipeline_mode<synchronous>, transform_indices = @transform_6, window_bounds = array<i64: 1, 128>}, {transform_indices = @transform_7, window_bounds = array<i64: 256, 128>}]} {
    %c0 = arith.constant 0 : index
    %c0_0 = arith.constant 0 : index
    %0 = vector.load %arg1[%c0, %c0_0] : memref<256x16xbf16, #tpu.memory_space<vmem>>, vector<256x16xbf16>
    %c0_1 = arith.constant 0 : index
    %c0_2 = arith.constant 0 : index
    %1 = vector.load %arg2[%c0_1, %c0_2] : memref<16x128xbf16, #tpu.memory_space<vmem>>, vector<16x128xbf16>
    %cst = arith.constant dense<0.000000e+00> : vector<256x128xf32>
    %2 = tpu.matmul %0, %1, %cst {dimension_numbers = #tpu.dot_dimension_numbers<[1], [0], [0], [1], [0, 0, 1, 1], [], []>} : vector<256x16xbf16>, vector<16x128xbf16>, vector<256x128xf32> -> vector<256x128xf32>
    %c0_3 = arith.constant 0 : index
    %c0_4 = arith.constant 0 : index
    %3 = vector.load %arg3[%c0_3, %c0_4] : memref<1x128xf32, #tpu.memory_space<vmem>>, vector<1x128xf32>
    %4 = vector.broadcast %3 : vector<1x128xf32> to vector<256x128xf32>
    %5 = arith.addf %2, %4 : vector<256x128xf32>
    %cst_5 = arith.constant 0.000000e+00 : f32
    %6 = vector.broadcast %cst_5 : f32 to vector<256x128xf32>
    %7 = arith.maximumf %5, %6 : vector<256x128xf32>
    %8 = arith.truncf %7 : vector<256x128xf32> to vector<256x128xbf16>
    %c0_6 = arith.constant 0 : index
    %c0_7 = arith.constant 0 : index
    %9 = vector.load %arg4[%c0_6, %c0_7] : memref<128x128xbf16, #tpu.memory_space<vmem>>, vector<128x128xbf16>
    %cst_8 = arith.constant dense<0.000000e+00> : vector<256x128xf32>
    %10 = tpu.matmul %8, %9, %cst_8 {dimension_numbers = #tpu.dot_dimension_numbers<[1], [0], [0], [1], [0, 0, 1, 1], [], []>} : vector<256x128xbf16>, vector<128x128xbf16>, vector<256x128xf32> -> vector<256x128xf32>
    %c0_9 = arith.constant 0 : index
    %c0_10 = arith.constant 0 : index
    %11 = vector.load %arg5[%c0_9, %c0_10] : memref<1x128xf32, #tpu.memory_space<vmem>>, vector<1x128xf32>
    %12 = vector.broadcast %11 : vector<1x128xf32> to vector<256x128xf32>
    %13 = arith.addf %10, %12 : vector<256x128xf32>
    %cst_11 = arith.constant 0.000000e+00 : f32
    %14 = vector.broadcast %cst_11 : f32 to vector<256x128xf32>
    %15 = arith.maximumf %13, %14 : vector<256x128xf32>
    %16 = arith.truncf %15 : vector<256x128xf32> to vector<256x128xbf16>
    %c0_12 = arith.constant 0 : index
    %c0_13 = arith.constant 0 : index
    %17 = vector.load %arg6[%c0_12, %c0_13] : memref<128x128xbf16, #tpu.memory_space<vmem>>, vector<128x128xbf16>
    %cst_14 = arith.constant dense<0.000000e+00> : vector<256x128xf32>
    %18 = tpu.matmul %16, %17, %cst_14 {dimension_numbers = #tpu.dot_dimension_numbers<[1], [0], [0], [1], [0, 0, 1, 1], [], []>} : vector<256x128xbf16>, vector<128x128xbf16>, vector<256x128xf32> -> vector<256x128xf32>
    %c0_15 = arith.constant 0 : index
    %c0_16 = arith.constant 0 : index
    %19 = vector.load %arg7[%c0_15, %c0_16] : memref<1x128xf32, #tpu.memory_space<vmem>>, vector<1x128xf32>
    %20 = vector.broadcast %19 : vector<1x128xf32> to vector<256x128xf32>
    %21 = arith.addf %18, %20 : vector<256x128xf32>
    %c0_17 = arith.constant 0 : index
    %c0_18 = arith.constant 0 : index
    %22 = vector.load %arg8[%c0_17, %c0_18] : memref<256x128xf32, #tpu.memory_space<vmem>>, vector<256x128xf32>
    tpu.vector_store %arg8[%c0_17, %c0_18], %21 {strides = array<i32>} : memref<256x128xf32, #tpu.memory_space<vmem>>, vector<256x128xf32>,
    return
  }
  func.func @transform_0(%arg0: i32) -> (i32, i32) {
    %c0_i32 = arith.constant 0 : i32
    %c0_i32_0 = arith.constant 0 : i32
    return %arg0, %c0_i32 : i32, i32
  }
  func.func @transform_1(%arg0: i32) -> (i32, i32) {
    %c0_i32 = arith.constant 0 : i32
    %c0_i32_0 = arith.constant 0 : i32
    %c0_i32_1 = arith.constant 0 : i32
    return %c0_i32, %c0_i32_0 : i32, i32
  }
  func.func @transform_2(%arg0: i32) -> (i32, i32) {
    %c0_i32 = arith.constant 0 : i32
    %c0_i32_0 = arith.constant 0 : i32
    %c0_i32_1 = arith.constant 0 : i32
    return %c0_i32, %c0_i32_0 : i32, i32
  }
  func.func @transform_3(%arg0: i32) -> (i32, i32) {
    %c0_i32 = arith.constant 0 : i32
    %c0_i32_0 = arith.constant 0 : i32
    %c0_i32_1 = arith.constant 0 : i32
    return %c0_i32, %c0_i32_0 : i32, i32
  }
  func.func @transform_4(%arg0: i32) -> (i32, i32) {
    %c0_i32 = arith.constant 0 : i32
    %c0_i32_0 = arith.constant 0 : i32
    %c0_i32_1 = arith.constant 0 : i32
    return %c0_i32, %c0_i32_0 : i32, i32
  }
  func.func @transform_5(%arg0: i32) -> (i32, i32) {
    %c0_i32 = arith.constant 0 : i32
    %c0_i32_0 = arith.constant 0 : i32
    %c0_i32_1 = arith.constant 0 : i32
    return %c0_i32, %c0_i32_0 : i32, i32
  }
  func.func @transform_6(%arg0: i32) -> (i32, i32) {
    %c0_i32 = arith.constant 0 : i32
    %c0_i32_0 = arith.constant 0 : i32
    %c0_i32_1 = arith.constant 0 : i32
    return %c0_i32, %c0_i32_0 : i32, i32
  }
  func.func @transform_7(%arg0: i32) -> (i32, i32) {
    %c0_i32 = arith.constant 0 : i32
    %c0_i32_0 = arith.constant 0 : i32
    return %arg0, %c0_i32 : i32, i32
  }
}

</mosaic_0001>

<bundles_post_ra>
// kernel: tpu_custom_call.1
= control target key start
LH: loop header
LB: loop body
LE: loop exit
PB: predicated region body
PF: predicated region fallthrough
CT: control target
= control target key end

     0   :  { %vm155_vm0 = vcmask 130048   ;;  %s1569_s0 = inlined_call_operand.vmem [shape: bf16[256,16], index: 0, kind: input, shape index: {}]   ;;  %s1570_s1 = inlined_call_operand.vmem [shape: bf16[16,128], index: 1, kind: input, shape index: {}]   ;;  %s1571_s2 = inlined_call_operand.vmem [shape: f32[1,128], index: 2, kind: input, shape index: {}]   ;;  %s1572_s3 = inlined_call_operand.vmem [shape: bf16[128,128], index: 3, kind: input, shape index: {}]   ;;  %s1573_s4 = inlined_call_operand.vmem [shape: f32[1,128], index: 4, kind: input, shape index: {}]   ;;  %s1574_s5 = inlined_call_operand.vmem [shape: bf16[128,128], index: 5, kind: input, shape index: {}]   ;;  %s1575_s6 = inlined_call_operand.vmem [shape: f32[1,128], index: 6, kind: input, shape index: {}]   ;;  %s1576_s7 = inlined_call_operand.hbm [shape: f32[256,128], index: 7, kind: output, shape index: {}]  }
   0x1   :  { %v1225_v0 = vld [vmem:[%s1570_s1] sm:$0xff]   ;;  %v1227_v2 = vld [vmem:[%s1569_s0 + $0x8] sm:$0xff]   ;;  %v1228_v3 = vld [vmem:[%s1569_s0 + $0x10] sm:$0xff]  }
   0x2   :  { %v1226_v1 = vld [vmem:[%s1569_s0] sm:$0xff]   ;;  %1090 = vmatprep.subr.bf16.mxu0 %v1225_v0  ;;  %1220 = vmatprep.subr.bf16.mxu1 %v1225_v0  ;;  %v1229_v4 = vld [vmem:[%s1569_s0 + $0x18] sm:$0xff]   ;;  %v1235_v7 = vld [vmem:[%s1569_s0 + $0x48] sm:$0xff]  }
   0x3   :  { %1091 = vmatpush3.bf16.msra.mxu0 %v1225_v0  ;;  %1092 = vmatprep.mubr.msk.bf16.mxu0 %vm155_vm0, %v1226_v1  ;;  %v1230_v5 = vld [vmem:[%s1569_s0 + $0x20] sm:$0xff]   ;;  %v1236_v8 = vld [vmem:[%s1569_s0 + $0x50] sm:$0xff]   ;;  %v1237_v9 = vld [vmem:[%s1569_s0 + $0x58] sm:$0xff]  }
   0x4   :  { %1221 = vmatpush3.bf16.msra.mxu1 %v1225_v0  ;;  %v1234_v6 = vld [vmem:[%s1569_s0 + $0x40] sm:$0xff]   ;;  %v1231_v10 = vld [vmem:[%s1569_s0 + $0x28] sm:$0xff]   ;;  %v1232_v14 = vld [vmem:[%s1569_s0 + $0x30] sm:$0xff]  }
   0x5   :  { %1108 = vmatprep.mubr.msk.bf16.mxu1 %vm155_vm0, %v1234_v6  ;;  %v1238_v11 = vld [vmem:[%s1569_s0 + $0x60] sm:$0xff]   ;;  %v1243_v13 = vld [vmem:[%s1572_s3 + $0x8] sm:$0xff]   ;;  %v1244_v16 = vld [vmem:[%s1572_s3 + $0x10] sm:$0xff]  }
   0x6   :  { %1093 = vmatmul.mubr.msk.bf16.vlgmr.msra.gmra.mrb[0].mxu0 %vm155_vm0, %v1227_v2  ;;  %v1242_v12 = vld [vmem:[%s1572_s3] sm:$0xff]   ;;  %v1239_v15 = vld [vmem:[%s1569_s0 + $0x68] sm:$0xff]   ;;  %v1240_v17 = vld [vmem:[%s1569_s0 + $0x70] sm:$0xff]  }
   0x7   :  { %1096 = vmatprep.mubr.msk.bf16.mxu0 %vm155_vm0, %v1228_v3  ;;  %1109 = vmatmul.mubr.msk.bf16.vlgmr.msra.gmra.mrb[0].mxu1 %vm155_vm0, %v1235_v7  ;;  %v1233_v18 = vld [vmem:[%s1569_s0 + $0x38] sm:$0xff]  }
   0x8   :  { %1112 = vmatprep.mubr.msk.bf16.mxu1 %vm155_vm0, %v1236_v8  ;;  %1124 = vmatprep.subr.bf16.mxu1 %v1242_v12  ;;  %v1245_v19 = vld [vmem:[%s1572_s3 + $0x18] sm:$0xff]  }
   0x9   :  { %1125 = vmatpush3.bf16.msra.mxu1 %v1242_v12 }
   0xa   :  { %1126 = vmatprep.subr.bf16.mxu1 %v1243_v13 }
   0xd   :  { %1127 = vmatpush3.bf16.msra.mxu1 %v1243_v13 }
   0xe   :  { %1097 = vmatmul.mubr.msk.bf16.gmra.mrb[4].mxu0 %vm155_vm0, %v1229_v4  ;;  %1128 = vmatprep.subr.bf16.mxu1 %v1244_v16 }
   0xf   :  { %1100 = vmatprep.mubr.msk.bf16.mxu0 %vm155_vm0, %v1230_v5  ;;  %1113 = vmatmul.mubr.msk.bf16.gmra.mrb[4].mxu1 %vm155_vm0, %v1237_v9 }
  0x10   :  { %1116 = vmatprep.mubr.msk.bf16.mxu1 %vm155_vm0, %v1238_v11 }
  0x11   :  { %1129 = vmatpush3.bf16.msra.mxu1 %v1244_v16 }
  0x16   :  { %1101 = vmatmul.mubr.msk.bf16.gmra.mrb[8].mxu0 %vm155_vm0, %v1231_v10 }
  0x17   :  { %1104 = vmatprep.mubr.msk.bf16.mxu0 %vm155_vm0, %v1232_v14  ;;  %1117 = vmatmul.mubr.msk.bf16.gmra.mrb[8].mxu1 %vm155_vm0, %v1239_v15 }
  0x18   :  { %1120 = vmatprep.mubr.msk.bf16.mxu1 %vm155_vm0, %v1240_v17 }
  0x19   :  { %12 = vsyncpa [#allocation3], 0  ;;  %1130 = vmatprep.subr.bf16.mxu1 %v1245_v19  ;;  %v1246_v20 = vld [vmem:[%s1572_s3 + $0x20] sm:$0xff]   ;;  %v1241_v21 = vld [vmem:[%s1569_s0 + $0x78] sm:$0xff]  }
  0x1a   :  { %1131 = vmatpush3.bf16.msra.mxu1 %v1245_v19  ;;  %v1247_v22 = vld [vmem:[%s1572_s3 + $0x28] sm:$0xff]   ;;  %v1248_v23 = vld [vmem:[%s1572_s3 + $0x30] sm:$0xff]   ;;  %v1249_v24 = vld [vmem:[%s1572_s3 + $0x38] sm:$0xff]  }
  0x1b   :  { %1132 = vmatprep.subr.bf16.mxu1 %v1246_v20  ;;  %v1250_v25 = vld [vmem:[%s1574_s5] sm:$0xff]   ;;  %v1251_v26 = vld [vmem:[%s1574_s5 + $0x8] sm:$0xff]   ;;  %v1252_v27 = vld [vmem:[%s1574_s5 + $0x10] sm:$0xff]  }
  0x1c   :  { %1172 = vmatprep.subr.bf16.mxu0 %v1250_v25  ;;  %v1253_v28 = vld [vmem:[%s1574_s5 + $0x18] sm:$0xff]   ;;  %v1254_v29 = vld [vmem:[%s1574_s5 + $0x20] sm:$0xff]   ;;  %v1255_v30 = vld [vmem:[%s1574_s5 + $0x28] sm:$0xff]  }
  0x1d   :  { %1173 = vmatpush3.bf16.msra.mxu0 %v1250_v25  ;;  %v1437_v31 = vld [vmem:[%s1571_s2] ss:$0 sm:$0xff] }
  0x1e   :  { %1105 = vmatmul.mubr.msk.bf16.gmra.mrb[12].mxu0 %vm155_vm0, %v1233_v18  ;;  %1133 = vmatpush3.bf16.msra.mxu1 %v1246_v20 }
  0x1f   :  { %1121 = vmatmul.mubr.msk.bf16.gmra.mrb[12].mxu1 %vm155_vm0, %v1241_v21  ;;  %1134 = vmatprep.subr.bf16.mxu1 %v1247_v22 }
  0x20   :  { %1174 = vmatprep.subr.bf16.mxu0 %v1251_v26 }
  0x21   :  { %1175 = vmatpush3.bf16.msra.mxu0 %v1251_v26 }
  0x22   :  { %1135 = vmatpush3.bf16.msra.mxu1 %v1247_v22  ;;  %1176 = vmatprep.subr.bf16.mxu0 %v1252_v27 }
  0x23   :  { %1136 = vmatprep.subr.bf16.mxu1 %v1248_v23 }
  0x25   :  { %1177 = vmatpush3.bf16.msra.mxu0 %v1252_v27 }
  0x26   :  { %1137 = vmatpush3.bf16.msra.mxu1 %v1248_v23  ;;  %1178 = vmatprep.subr.bf16.mxu0 %v1253_v28 }
  0x27   :  { %1138 = vmatprep.subr.bf16.mxu1 %v1249_v24 }
  0x29   :  { %1179 = vmatpush3.bf16.msra.mxu0 %v1253_v28 }
  0x2a   :  { %1139 = vmatpush3.bf16.msra.mxu1 %v1249_v24  ;;  %1180 = vmatprep.subr.bf16.mxu0 %v1254_v29 }
  0x2d   :  { %1181 = vmatpush3.bf16.msra.mxu0 %v1254_v29 }
  0x2e   :  { %1182 = vmatprep.subr.bf16.mxu0 %v1255_v30 }
  0x31   :  { %1183 = vmatpush3.bf16.msra.mxu0 %v1255_v30 }
  0xd9   :  { %v1094_v32 = vpop.f32.mrb[0].mxu0 }
  0xda   :  { %v247_v33 = vadd.f32 %v1094_v32, %v1437_v31  ;;  %v238_v34 = vpop.f32.mrb[1].mxu0  ;;  %v1110_v44 = vpop.f32.mrb[0].mxu1 }
  0xdb   :  { %v239_v35 = vadd.f32 %v1437_v31, %v238_v34  ;;  %v1095_v36 = vpop.f32.mrb[2].mxu0  ;;  %v311_v46 = vadd.f32 %v1110_v44, %v1437_v31  ;;  %v302_v47 = vpop.f32.mrb[1].mxu1 }
  0xdc   :  { %v250_v37 = vadd.f32 %v1095_v36, %v1437_v31  ;;  %v241_v38 = vpop.f32.mrb[3].mxu0  ;;  %v367_v40 = vmax.f32 %v247_v33, 0.0  ;;  %v303_v50 = vadd.f32 %v1437_v31, %v302_v47  ;;  %v1111_v51 = vpop.f32.mrb[2].mxu1 }
  0xdd   :  { %v242_v39 = vadd.f32 %v1437_v31, %v241_v38  ;;  %v365_v42 = vmax.f32 %v239_v35, 0.0  ;;  %v383_v54 = vmax.f32 %v311_v46, 0.0  ;;  %v314_v55 = vadd.f32 %v1111_v51, %v1437_v31  ;;  %v305_v56 = vpop.f32.mrb[3].mxu1 }
  0xde   :  { %v368_v41 = vmax.f32 %v250_v37, 0.0  ;;  %v381_v59 = vmax.f32 %v303_v50, 0.0  ;;  %v306_v60 = vadd.f32 %v1437_v31, %v305_v56 }
  0xdf   :  { %v366_v43 = vmax.f32 %v242_v39, 0.0  ;;  %v384_v63 = vmax.f32 %v314_v55, 0.0 }
  0xe0   :  { %v398_v45 = vpack.c.bf16 %v368_v41, %v367_v40  ;;  %v382_v1 = vmax.f32 %v306_v60, 0.0 }
  0xe1   :  { %v397_v48 = vpack.c.bf16 %v366_v43, %v365_v42  ;;  %v1098_v49 = vpop.f32.mrb[4].mxu0  ;;  %v1451_v4 = vpack.c.bf16 %v384_v63, %v383_v54 }
  0xe2   :  { %v263_v52 = vadd.f32 %v1098_v49, %v1437_v31  ;;  %v254_v53 = vpop.f32.mrb[5].mxu0  ;;  %v1453_v7 = vpack.c.bf16 %v382_v1, %v381_v59  ;;  %v1114_v8 = vpop.f32.mrb[4].mxu1 }
  0xe3   :  { %v255_v57 = vadd.f32 %v1437_v31, %v254_v53  ;;  %v1099_v58 = vpop.f32.mrb[6].mxu0  ;;  %1140 = vmatprep.mubr.bf16.mxu1 %v397_v48  ;;  %v327_v10 = vadd.f32 %v1114_v8, %v1437_v31  ;;  %v318_v11 = vpop.f32.mrb[5].mxu1 }
  0xe4   :  { %v266_v61 = vadd.f32 %v1099_v58, %v1437_v31  ;;  %v257_v62 = vpop.f32.mrb[7].mxu0  ;;  %1141 = vmatmul.mubr.bf16.vlgmr.msra.gmra.mrb[16].mxu1 %v398_v45  ;;  %v371_v2 = vmax.f32 %v263_v52, 0.0  ;;  %v319_v14 = vadd.f32 %v1437_v31, %v318_v11  ;;  %v1115_v15 = vpop.f32.mrb[6].mxu1 }
  0xe5   :  { %v258_v0 = vadd.f32 %v1437_v31, %v257_v62  ;;  %v369_v5 = vmax.f32 %v255_v57, 0.0  ;;  %v387_v18 = vmax.f32 %v327_v10, 0.0  ;;  %v330_v19 = vadd.f32 %v1115_v15, %v1437_v31  ;;  %v321_v20 = vpop.f32.mrb[7].mxu1 }
  0xe6   :  { %v372_v3 = vmax.f32 %v266_v61, 0.0  ;;  %v385_v23 = vmax.f32 %v319_v14, 0.0  ;;  %v322_v24 = vadd.f32 %v1437_v31, %v321_v20 }
  0xe7   :  { %v370_v6 = vmax.f32 %v258_v0, 0.0  ;;  %v388_v27 = vmax.f32 %v330_v19, 0.0  ;;  %v1256_v19 = vld [vmem:[%s1574_s5 + $0x30] sm:$0xff]  }
  0xe8   :  { %v400_v9 = vpack.c.bf16 %v372_v3, %v371_v2  ;;  %v386_v29 = vmax.f32 %v322_v24, 0.0  ;;  %1184 = vmatprep.subr.bf16.mxu0 %v1256_v19 }
  0xe9   :  { %v399_v12 = vpack.c.bf16 %v370_v6, %v369_v5  ;;  %v1102_v13 = vpop.f32.mrb[8].mxu0  ;;  %v408_v33 = vpack.c.bf16 %v388_v27, %v387_v18  ;;  %1185 = vmatpush3.bf16.msra.mxu0 %v1256_v19 }
  0xea   :  { %v279_v16 = vadd.f32 %v1102_v13, %v1437_v31  ;;  %v270_v17 = vpop.f32.mrb[9].mxu0  ;;  %v407_v36 = vpack.c.bf16 %v386_v29, %v385_v23  ;;  %v1118_v37 = vpop.f32.mrb[8].mxu1 }
  0xeb   :  { %v271_v21 = vadd.f32 %v1437_v31, %v270_v17  ;;  %v1103_v22 = vpop.f32.mrb[10].mxu0  ;;  %1144 = vmatprep.mubr.bf16.mxu1 %v399_v12  ;;  %v343_v39 = vadd.f32 %v1118_v37, %v1437_v31  ;;  %v334_v40 = vpop.f32.mrb[9].mxu1 }
  0xec   :  { %v282_v25 = vadd.f32 %v1103_v22, %v1437_v31  ;;  %v273_v26 = vpop.f32.mrb[11].mxu0  ;;  %1145 = vmatmul.mubr.bf16.gmra.mrb[20].mxu1 %v400_v9  ;;  %v375_v30 = vmax.f32 %v279_v16, 0.0  ;;  %v335_v43 = vadd.f32 %v1437_v31, %v334_v40  ;;  %v1119_v44 = vpop.f32.mrb[10].mxu1 }
  0xed   :  { %v274_v28 = vadd.f32 %v1437_v31, %v273_v26  ;;  %v373_v34 = vmax.f32 %v271_v21, 0.0  ;;  %v391_v47 = vmax.f32 %v343_v39, 0.0  ;;  %v346_v48 = vadd.f32 %v1119_v44, %v1437_v31  ;;  %v337_v49 = vpop.f32.mrb[11].mxu1 }
  0xee   :  { %v376_v32 = vmax.f32 %v282_v25, 0.0  ;;  %v389_v52 = vmax.f32 %v335_v43, 0.0  ;;  %v338_v53 = vadd.f32 %v1437_v31, %v337_v49 }
  0xef   :  { %v374_v35 = vmax.f32 %v274_v28, 0.0  ;;  %v392_v56 = vmax.f32 %v346_v48, 0.0 }
  0xf0   :  { %v402_v38 = vpack.c.bf16 %v376_v32, %v375_v30  ;;  %v390_v58 = vmax.f32 %v338_v53, 0.0 }
  0xf1   :  { %v401_v41 = vpack.c.bf16 %v374_v35, %v373_v34  ;;  %v1106_v42 = vpop.f32.mrb[12].mxu0  ;;  %v410_v61 = vpack.c.bf16 %v392_v56, %v391_v47 }
  0xf2   :  { %v295_v45 = vadd.f32 %v1106_v42, %v1437_v31  ;;  %v286_v46 = vpop.f32.mrb[13].mxu0  ;;  %v409_v0 = vpack.c.bf16 %v390_v58, %v389_v52  ;;  %v1122_v1 = vpop.f32.mrb[12].mxu1 }
  0xf3   :  { %v287_v50 = vadd.f32 %v1437_v31, %v286_v46  ;;  %v1107_v51 = vpop.f32.mrb[14].mxu0  ;;  %1148 = vmatprep.mubr.bf16.mxu1 %v401_v41  ;;  %v359_v3 = vadd.f32 %v1122_v1, %v1437_v31  ;;  %v350_v5 = vpop.f32.mrb[13].mxu1 }
  0xf4   :  { %v298_v54 = vadd.f32 %v1107_v51, %v1437_v31  ;;  %v289_v55 = vpop.f32.mrb[15].mxu0  ;;  %1149 = vmatmul.mubr.bf16.gmra.mrb[24].mxu1 %v402_v38  ;;  %v379_v59 = vmax.f32 %v295_v45, 0.0  ;;  %v351_v8 = vadd.f32 %v1437_v31, %v350_v5  ;;  %v1123_v9 = vpop.f32.mrb[14].mxu1 }
  0xf5   :  { %v290_v57 = vadd.f32 %v1437_v31, %v289_v55  ;;  %v377_v62 = vmax.f32 %v287_v50, 0.0  ;;  %v395_v10 = vmax.f32 %v359_v3, 0.0  ;;  %v362_v11 = vadd.f32 %v1123_v9, %v1437_v31  ;;  %v353_v12 = vpop.f32.mrb[15].mxu1 }
  0xf6   :  { %v380_v60 = vmax.f32 %v298_v54, 0.0  ;;  %v393_v13 = vmax.f32 %v351_v8, 0.0  ;;  %v354_v14 = vadd.f32 %v1437_v31, %v353_v12  ;;  %v1257_v31 = vld [vmem:[%s1574_s5 + $0x38] sm:$0xff]  }
  0xf7   :  { %v378_v63 = vmax.f32 %v290_v57, 0.0  ;;  %v396_v15 = vmax.f32 %v362_v11, 0.0  ;;  %1186 = vmatprep.subr.bf16.mxu0 %v1257_v31 }
  0xf8   :  { %v404_v2 = vpack.c.bf16 %v380_v60, %v379_v59  ;;  %v394_v16 = vmax.f32 %v354_v14, 0.0  ;;  %1187 = vmatpush3.bf16.msra.mxu0 %v1257_v31 }
  0xf9   :  { %v403_v6 = vpack.c.bf16 %v378_v63, %v377_v62  ;;  %v412_v17 = vpack.c.bf16 %v396_v15, %v395_v10 }
  0xfa   :  { %v411_v18 = vpack.c.bf16 %v394_v16, %v393_v13 }
  0xfb   :  { %1152 = vmatprep.mubr.bf16.mxu1 %v403_v6 }
  0xfc   :  { %1153 = vmatmul.mubr.bf16.gmra.mrb[28].mxu1 %v404_v2 }
  0xfd   :  { %1156 = vmatprep.mubr.bf16.mxu1 %v1453_v7 }
 0x104   :  { %1157 = vmatmul.mubr.bf16.gmra.mrb[32].mxu1 %v1451_v4  ;;  %v1486_v4 = vld [vmem:[%s1573_s4] ss:$0 sm:$0xff] }
 0x105   :  { %1160 = vmatprep.mubr.bf16.mxu1 %v407_v36 }
 0x10c   :  { %1161 = vmatmul.mubr.bf16.gmra.mrb[36].mxu1 %v408_v33 }
 0x10d   :  { %1164 = vmatprep.mubr.bf16.mxu1 %v409_v0 }
 0x114   :  { %1165 = vmatmul.mubr.bf16.gmra.mrb[40].mxu1 %v410_v61 }
 0x115   :  { %1168 = vmatprep.mubr.bf16.mxu1 %v411_v18 }
 0x11c   :  { %1169 = vmatmul.mubr.bf16.gmra.mrb[44].mxu1 %v412_v17 }
 0x1b7   :  { %v1142_v7 = vpop.f32.mrb[16].mxu1 }
 0x1b8   :  { %v527_v20 = vadd.f32 %v1142_v7, %v1486_v4  ;;  %v518_v21 = vpop.f32.mrb[17].mxu1 }
 0x1b9   :  { %v519_v22 = vadd.f32 %v1486_v4, %v518_v21  ;;  %v1143_v23 = vpop.f32.mrb[18].mxu1 }
 0x1ba   :  { %v530_v24 = vadd.f32 %v1143_v23, %v1486_v4  ;;  %v521_v25 = vpop.f32.mrb[19].mxu1  ;;  %v647_v27 = vmax.f32 %v527_v20, 0.0 }
 0x1bb   :  { %v522_v26 = vadd.f32 %v1486_v4, %v521_v25  ;;  %v645_v29 = vmax.f32 %v519_v22, 0.0 }
 0x1bc   :  { %v648_v28 = vmax.f32 %v530_v24, 0.0 }
 0x1bd   :  { %v646_v30 = vmax.f32 %v522_v26, 0.0 }
 0x1be   :  { %v678_v32 = vpack.c.bf16 %v648_v28, %v647_v27 }
 0x1bf   :  { %v677_v33 = vpack.c.bf16 %v646_v30, %v645_v29  ;;  %v1146_v34 = vpop.f32.mrb[20].mxu1 }
 0x1c0   :  { %v543_v35 = vadd.f32 %v1146_v34, %v1486_v4  ;;  %v534_v36 = vpop.f32.mrb[21].mxu1 }
 0x1c1   :  { %v535_v37 = vadd.f32 %v1486_v4, %v534_v36  ;;  %v1147_v38 = vpop.f32.mrb[22].mxu1  ;;  %1188 = vmatprep.mubr.bf16.mxu0 %v677_v33 }
 0x1c2   :  { %v546_v39 = vadd.f32 %v1147_v38, %v1486_v4  ;;  %v537_v40 = vpop.f32.mrb[23].mxu1  ;;  %1189 = vmatmul.mubr.bf16.vlgmr.msra.gmra.mrb[16].mxu0 %v678_v32  ;;  %v651_v42 = vmax.f32 %v543_v35, 0.0 }
 0x1c3   :  { %v538_v41 = vadd.f32 %v1486_v4, %v537_v40  ;;  %v649_v44 = vmax.f32 %v535_v37, 0.0 }
 0x1c4   :  { %v652_v43 = vmax.f32 %v546_v39, 0.0 }
 0x1c5   :  { %v650_v45 = vmax.f32 %v538_v41, 0.0 }
 0x1c6   :  { %v680_v46 = vpack.c.bf16 %v652_v43, %v651_v42 }
 0x1c7   :  { %v679_v47 = vpack.c.bf16 %v650_v45, %v649_v44  ;;  %v1150_v48 = vpop.f32.mrb[24].mxu1 }
 0x1c8   :  { %v559_v49 = vadd.f32 %v1150_v48, %v1486_v4  ;;  %v550_v50 = vpop.f32.mrb[25].mxu1 }
 0x1c9   :  { %v551_v51 = vadd.f32 %v1486_v4, %v550_v50  ;;  %v1151_v52 = vpop.f32.mrb[26].mxu1  ;;  %1192 = vmatprep.mubr.bf16.mxu0 %v679_v47 }
 0x1ca   :  { %v562_v53 = vadd.f32 %v1151_v52, %v1486_v4  ;;  %v553_v54 = vpop.f32.mrb[27].mxu1  ;;  %1193 = vmatmul.mubr.bf16.gmra.mrb[20].mxu0 %v680_v46  ;;  %v655_v56 = vmax.f32 %v559_v49, 0.0 }
 0x1cb   :  { %v554_v55 = vadd.f32 %v1486_v4, %v553_v54  ;;  %v653_v58 = vmax.f32 %v551_v51, 0.0 }
 0x1cc   :  { %v656_v57 = vmax.f32 %v562_v53, 0.0 }
 0x1cd   :  { %v654_v59 = vmax.f32 %v554_v55, 0.0 }
 0x1ce   :  { %v682_v60 = vpack.c.bf16 %v656_v57, %v655_v56 }
 0x1cf   :  { %v681_v61 = vpack.c.bf16 %v654_v59, %v653_v58  ;;  %v1154_v62 = vpop.f32.mrb[28].mxu1 }
 0x1d0   :  { %v575_v63 = vadd.f32 %v1154_v62, %v1486_v4  ;;  %v566_v0 = vpop.f32.mrb[29].mxu1 }
 0x1d1   :  { %v567_v1 = vadd.f32 %v1486_v4, %v566_v0  ;;  %v1155_v2 = vpop.f32.mrb[30].mxu1  ;;  %1196 = vmatprep.mubr.bf16.mxu0 %v681_v61 }
 0x1d2   :  { %v578_v3 = vadd.f32 %v1155_v2, %v1486_v4  ;;  %v569_v5 = vpop.f32.mrb[31].mxu1  ;;  %1197 = vmatmul.mubr.bf16.gmra.mrb[24].mxu0 %v682_v60  ;;  %v659_v8 = vmax.f32 %v575_v63, 0.0 }
 0x1d3   :  { %v570_v6 = vadd.f32 %v1486_v4, %v569_v5  ;;  %v657_v10 = vmax.f32 %v567_v1, 0.0 }
 0x1d4   :  { %v660_v9 = vmax.f32 %v578_v3, 0.0 }
 0x1d5   :  { %v658_v11 = vmax.f32 %v570_v6, 0.0  ;;  %v1523_v6 = vld [vmem:[%s1575_s6] ss:$0 sm:$0xff]  ;;  %s1282_s6 = smov [#allocation2]  }
 0x1d6   :  { %v684_v12 = vpack.c.bf16 %v660_v9, %v659_v8  ;;  %s962_s19 = sshll.u32 %s1282_s6, 4  ;;  %s963_s19 = int_to_ptr.vmem [resolvable:$true] %s962_s19 }
 0x1d7   :  { %v683_v13 = vpack.c.bf16 %v658_v11, %v657_v10  ;;  %v1158_v14 = vpop.f32.mrb[32].mxu1  ;;  %s1258_s20 = scalar_lea.vmem %s963_s19, 4096  ;;  %p1263_p1 = scmp.lt.s32.totalorder %s963_s19, %s963_s19 }
 0x1d8   :  { %v591_v15 = vadd.f32 %v1158_v14, %v1486_v4  ;;  %v582_v16 = vpop.f32.mrb[33].mxu1  ;;  %p1259_p0 = scmp.ne.s32.totalorder %s963_s19, %s1258_s20  ;;  %p1264_p2 = scmp.lt.s32.totalorder %s1258_s20, %s1258_s20 }
 0x1d9   :  { %v583_v17 = vadd.f32 %v1486_v4, %v582_v16  ;;  %v1159_v18 = vpop.f32.mrb[34].mxu1  ;;  %1200 = vmatprep.mubr.bf16.mxu0 %v683_v13 }
 0x1da   :  { %v594_v19 = vadd.f32 %v1159_v18, %v1486_v4  ;;  %v585_v31 = vpop.f32.mrb[35].mxu1  ;;  %1201 = vmatmul.mubr.bf16.gmra.mrb[28].mxu0 %v684_v12  ;;  %v663_v20 = vmax.f32 %v591_v15, 0.0  ;;  %p1265_p3 = por %p1264_p2, %p1263_p1 }
 0x1db   :  { %v586_v7 = vadd.f32 %v1486_v4, %v585_v31  ;;  %v661_v22 = vmax.f32 %v583_v17, 0.0 }
 0x1dc   :  { %v664_v21 = vmax.f32 %v594_v19, 0.0  ;;  %p1266_p4 = pnand %p1265_p3, %p1259_p0 }
 0x1dd   :  { %v662_v23 = vmax.f32 %v586_v7, 0.0 }
 0x1de   :  { %v686_v24 = vpack.c.bf16 %v664_v21, %v663_v20 }
 0x1df   :  { %v685_v25 = vpack.c.bf16 %v662_v23, %v661_v22  ;;  %v1162_v26 = vpop.f32.mrb[36].mxu1 }
 0x1e0   :  { %v607_v27 = vadd.f32 %v1162_v26, %v1486_v4  ;;  %v598_v28 = vpop.f32.mrb[37].mxu1 }
 0x1e1   :  { %v599_v29 = vadd.f32 %v1486_v4, %v598_v28  ;;  %v1163_v30 = vpop.f32.mrb[38].mxu1  ;;  %1204 = vmatprep.mubr.bf16.mxu0 %v685_v25 }
 0x1e2   :  { %v610_v32 = vadd.f32 %v1163_v30, %v1486_v4  ;;  %v601_v33 = vpop.f32.mrb[39].mxu1  ;;  %1205 = vmatmul.mubr.bf16.gmra.mrb[32].mxu0 %v686_v24  ;;  %v667_v35 = vmax.f32 %v607_v27, 0.0 }
 0x1e3   :  { %v602_v34 = vadd.f32 %v1486_v4, %v601_v33  ;;  %v665_v37 = vmax.f32 %v599_v29, 0.0 }
 0x1e4   :  { %v668_v36 = vmax.f32 %v610_v32, 0.0 }
 0x1e5   :  { %v666_v38 = vmax.f32 %v602_v34, 0.0 }
 0x1e6   :  { %v688_v39 = vpack.c.bf16 %v668_v36, %v667_v35 }
 0x1e7   :  { %v687_v40 = vpack.c.bf16 %v666_v38, %v665_v37  ;;  %v1166_v41 = vpop.f32.mrb[40].mxu1 }
 0x1e8   :  { %v623_v42 = vadd.f32 %v1166_v41, %v1486_v4  ;;  %v614_v43 = vpop.f32.mrb[41].mxu1 }
 0x1e9   :  { %v615_v44 = vadd.f32 %v1486_v4, %v614_v43  ;;  %v1167_v45 = vpop.f32.mrb[42].mxu1  ;;  %1208 = vmatprep.mubr.bf16.mxu0 %v687_v40 }
 0x1ea   :  { %v626_v46 = vadd.f32 %v1167_v45, %v1486_v4  ;;  %v617_v47 = vpop.f32.mrb[43].mxu1  ;;  %1209 = vmatmul.mubr.bf16.gmra.mrb[36].mxu0 %v688_v39  ;;  %v671_v49 = vmax.f32 %v623_v42, 0.0 }
 0x1eb   :  { %v618_v48 = vadd.f32 %v1486_v4, %v617_v47  ;;  %v669_v51 = vmax.f32 %v615_v44, 0.0 }
 0x1ec   :  { %v672_v50 = vmax.f32 %v626_v46, 0.0 }
 0x1ed   :  { %v670_v52 = vmax.f32 %v618_v48, 0.0 }
 0x1ee   :  { %v690_v53 = vpack.c.bf16 %v672_v50, %v671_v49 }
 0x1ef   :  { %v689_v54 = vpack.c.bf16 %v670_v52, %v669_v51  ;;  %v1170_v55 = vpop.f32.mrb[44].mxu1 }
 0x1f0   :  { %v639_v56 = vadd.f32 %v1170_v55, %v1486_v4  ;;  %v630_v57 = vpop.f32.mrb[45].mxu1 }
 0x1f1   :  { %v631_v58 = vadd.f32 %v1486_v4, %v630_v57  ;;  %v1171_v59 = vpop.f32.mrb[46].mxu1  ;;  %1212 = vmatprep.mubr.bf16.mxu0 %v689_v54 }
 0x1f2   :  { %v642_v60 = vadd.f32 %v1171_v59, %v1486_v4  ;;  %v633_v61 = vpop.f32.mrb[47].mxu1  ;;  %1213 = vmatmul.mubr.bf16.gmra.mrb[40].mxu0 %v690_v53  ;;  %v675_v63 = vmax.f32 %v639_v56, 0.0 }
 0x1f3   :  { %v634_v62 = vadd.f32 %v1486_v4, %v633_v61  ;;  %v673_v1 = vmax.f32 %v631_v58, 0.0 }
 0x1f4   :  { %v676_v0 = vmax.f32 %v642_v60, 0.0 }
 0x1f5   :  { %v674_v2 = vmax.f32 %v634_v62, 0.0 }
 0x1f6   :  { %v692_v3 = vpack.c.bf16 %v676_v0, %v675_v63 }
 0x1f7   :  { %v691_v5 = vpack.c.bf16 %v674_v2, %v673_v1 }
 0x1f9   :  { %1216 = vmatprep.mubr.bf16.mxu0 %v691_v5 }
 0x1fa   :  { %1217 = vmatmul.mubr.bf16.gmra.mrb[44].mxu0 %v692_v3 }
 0x295   :  { %v1190_v8 = vpop.f32.mrb[16].mxu0 }
 0x296   :  { %v807_v9 = vadd.f32 %v1190_v8, %v1523_v6  ;;  %v798_v10 = vpop.f32.mrb[17].mxu0 }
 0x297   :  { %v799_v11 = vadd.f32 %v1523_v6, %v798_v10  ;;  %v1191_v4 = vpop.f32.mrb[18].mxu0 }
 0x298   :  { %927 = vst [vmem:[#allocation2 + $0x10] sm:$0xff] %v807_v9  ;;  %v810_v12 = vadd.f32 %v1191_v4, %v1523_v6  ;;  %v801_v13 = vpop.f32.mrb[19].mxu0 }
 0x299   :  { %925 = vst [vmem:[#allocation2] sm:$0xff] %v799_v11  ;;  %v802_v14 = vadd.f32 %v1523_v6, %v801_v13 }
 0x29a   :  { %928 = vst [vmem:[#allocation2 + $0x18] sm:$0xff] %v810_v12 }
 0x29b   :  { %926 = vst [vmem:[#allocation2 + $0x8] sm:$0xff] %v802_v14 }
 0x29d   :  { %v1194_v15 = vpop.f32.mrb[20].mxu0 }
 0x29e   :  { %v823_v16 = vadd.f32 %v1194_v15, %v1523_v6  ;;  %v814_v17 = vpop.f32.mrb[21].mxu0 }
 0x29f   :  { %v815_v18 = vadd.f32 %v1523_v6, %v814_v17  ;;  %v1195_v19 = vpop.f32.mrb[22].mxu0 }
 0x2a0   :  { %931 = vst [vmem:[#allocation2 + $0x30] sm:$0xff] %v823_v16  ;;  %v826_v31 = vadd.f32 %v1195_v19, %v1523_v6  ;;  %v817_v7 = vpop.f32.mrb[23].mxu0 }
 0x2a1   :  { %929 = vst [vmem:[#allocation2 + $0x20] sm:$0xff] %v815_v18  ;;  %v818_v20 = vadd.f32 %v1523_v6, %v817_v7 }
 0x2a2   :  { %932 = vst [vmem:[#allocation2 + $0x38] sm:$0xff] %v826_v31 }
 0x2a3   :  { %930 = vst [vmem:[#allocation2 + $0x28] sm:$0xff] %v818_v20 }
 0x2a5   :  { %v1198_v21 = vpop.f32.mrb[24].mxu0 }
 0x2a6   :  { %v839_v22 = vadd.f32 %v1198_v21, %v1523_v6  ;;  %v830_v23 = vpop.f32.mrb[25].mxu0 }
 0x2a7   :  { %v831_v24 = vadd.f32 %v1523_v6, %v830_v23  ;;  %v1199_v25 = vpop.f32.mrb[26].mxu0 }
 0x2a8   :  { %935 = vst [vmem:[#allocation2 + $0x50] sm:$0xff] %v839_v22  ;;  %v842_v26 = vadd.f32 %v1199_v25, %v1523_v6  ;;  %v833_v27 = vpop.f32.mrb[27].mxu0 }
 0x2a9   :  { %933 = vst [vmem:[#allocation2 + $0x40] sm:$0xff] %v831_v24  ;;  %v834_v28 = vadd.f32 %v1523_v6, %v833_v27 }
 0x2aa   :  { %936 = vst [vmem:[#allocation2 + $0x58] sm:$0xff] %v842_v26 }
 0x2ab   :  { %934 = vst [vmem:[#allocation2 + $0x48] sm:$0xff] %v834_v28 }
 0x2ad   :  { %v1202_v29 = vpop.f32.mrb[28].mxu0 }
 0x2ae   :  { %v855_v30 = vadd.f32 %v1202_v29, %v1523_v6  ;;  %v846_v32 = vpop.f32.mrb[29].mxu0 }
 0x2af   :  { %v847_v33 = vadd.f32 %v1523_v6, %v846_v32  ;;  %v1203_v34 = vpop.f32.mrb[30].mxu0 }
 0x2b0   :  { %939 = vst [vmem:[#allocation2 + $0x70] sm:$0xff] %v855_v30  ;;  %v858_v35 = vadd.f32 %v1203_v34, %v1523_v6  ;;  %v849_v36 = vpop.f32.mrb[31].mxu0 }
 0x2b1   :  { %937 = vst [vmem:[#allocation2 + $0x60] sm:$0xff] %v847_v33  ;;  %v850_v37 = vadd.f32 %v1523_v6, %v849_v36 }
 0x2b2   :  { %940 = vst [vmem:[#allocation2 + $0x78] sm:$0xff] %v858_v35 }
 0x2b3   :  { %938 = vst [vmem:[#allocation2 + $0x68] sm:$0xff] %v850_v37 }
 0x2b5   :  { %v1206_v38 = vpop.f32.mrb[32].mxu0 }
 0x2b6   :  { %v871_v39 = vadd.f32 %v1206_v38, %v1523_v6  ;;  %v862_v40 = vpop.f32.mrb[33].mxu0 }
 0x2b7   :  { %v863_v41 = vadd.f32 %v1523_v6, %v862_v40  ;;  %v1207_v42 = vpop.f32.mrb[34].mxu0 }
 0x2b8   :  { %943 = vst [vmem:[#allocation2 + $0x90] sm:$0xff] %v871_v39  ;;  %v874_v43 = vadd.f32 %v1207_v42, %v1523_v6  ;;  %v865_v44 = vpop.f32.mrb[35].mxu0 }
 0x2b9   :  { %941 = vst [vmem:[#allocation2 + $0x80] sm:$0xff] %v863_v41  ;;  %v866_v45 = vadd.f32 %v1523_v6, %v865_v44 }
 0x2ba   :  { %944 = vst [vmem:[#allocation2 + $0x98] sm:$0xff] %v874_v43 }
 0x2bb   :  { %942 = vst [vmem:[#allocation2 + $0x88] sm:$0xff] %v866_v45 }
 0x2bd   :  { %v1210_v46 = vpop.f32.mrb[36].mxu0 }
 0x2be   :  { %v887_v47 = vadd.f32 %v1210_v46, %v1523_v6  ;;  %v878_v48 = vpop.f32.mrb[37].mxu0 }
 0x2bf   :  { %v879_v49 = vadd.f32 %v1523_v6, %v878_v48  ;;  %v1211_v50 = vpop.f32.mrb[38].mxu0 }
 0x2c0   :  { %947 = vst [vmem:[#allocation2 + $0xb0] sm:$0xff] %v887_v47  ;;  %v890_v51 = vadd.f32 %v1211_v50, %v1523_v6  ;;  %v881_v52 = vpop.f32.mrb[39].mxu0 }
 0x2c1   :  { %945 = vst [vmem:[#allocation2 + $0xa0] sm:$0xff] %v879_v49  ;;  %v882_v53 = vadd.f32 %v1523_v6, %v881_v52 }
 0x2c2   :  { %948 = vst [vmem:[#allocation2 + $0xb8] sm:$0xff] %v890_v51 }
 0x2c3   :  { %946 = vst [vmem:[#allocation2 + $0xa8] sm:$0xff] %v882_v53 }
 0x2c5   :  { %v1214_v54 = vpop.f32.mrb[40].mxu0 }
 0x2c6   :  { %v903_v55 = vadd.f32 %v1214_v54, %v1523_v6  ;;  %v894_v56 = vpop.f32.mrb[41].mxu0 }
 0x2c7   :  { %v895_v57 = vadd.f32 %v1523_v6, %v894_v56  ;;  %v1215_v58 = vpop.f32.mrb[42].mxu0 }
 0x2c8   :  { %951 = vst [vmem:[#allocation2 + $0xd0] sm:$0xff] %v903_v55  ;;  %v906_v59 = vadd.f32 %v1215_v58, %v1523_v6  ;;  %v897_v60 = vpop.f32.mrb[43].mxu0 }
 0x2c9   :  { %949 = vst [vmem:[#allocation2 + $0xc0] sm:$0xff] %v895_v57  ;;  %v898_v61 = vadd.f32 %v1523_v6, %v897_v60 }
 0x2ca   :  { %952 = vst [vmem:[#allocation2 + $0xd8] sm:$0xff] %v906_v59 }
 0x2cb   :  { %950 = vst [vmem:[#allocation2 + $0xc8] sm:$0xff] %v898_v61 }
 0x2cd   :  { %v1218_v62 = vpop.f32.mrb[44].mxu0 }
 0x2ce   :  { %v919_v63 = vadd.f32 %v1218_v62, %v1523_v6  ;;  %v910_v0 = vpop.f32.mrb[45].mxu0 }
 0x2cf   :  { %v911_v1 = vadd.f32 %v1523_v6, %v910_v0  ;;  %v1219_v2 = vpop.f32.mrb[46].mxu0 }
 0x2d0   :  { %955 = vst [vmem:[#allocation2 + $0xf0] sm:$0xff] %v919_v63  ;;  %v922_v3 = vadd.f32 %v1219_v2, %v1523_v6  ;;  %v913_v5 = vpop.f32.mrb[47].mxu0 }
 0x2d1   :  { %953 = vst [vmem:[#allocation2 + $0xe0] sm:$0xff] %v911_v1  ;;  %v914_v8 = vadd.f32 %v1523_v6, %v913_v5 }
 0x2d2   :  { %956 = vst [vmem:[#allocation2 + $0xf8] sm:$0xff] %v922_v3 }
 0x2d3   :  { %954 = vst [vmem:[#allocation2 + $0xe8] sm:$0xff] %v914_v8 }
 0x2d4   :  { %1269 = shalt.err (!%p1266_p4)
}
 0x2d5   :  { %s1270_s23 = scalar_lea.hbm %s1576_s7, 4096 }
 0x2d6   :  { %p1271_p5 = scmp.ne.s32.totalorder %s1576_s7, %s1270_s23  ;;  %p1274_p6 = scmp.lt.u32.totalorder %s1270_s23, %s1576_s7 }
 0x2d8   :  { %p1276_p7 = pnand %p1274_p6, %p1271_p5 }
 0x2da   :  { %1279 = shalt.err (!%p1276_p7)
}
 0x2db   :  { %s1283_s27 = smov 128   ;;  %s1284_s28 = smov 8  }
 0x2dc   :  { %968 = dma.vmem_to_hbm [thread:$0]  %s963_s19, 4096, %s1576_s7, [#allocation3], %s1283_s27, %s1283_s27, %s1284_s28  }
 0x2dd   :  { %1280 = dma.done.wait [#allocation3], 4096  }
 0x2de   :  { %1281 = vsyncadd [#allocation3], 4294963200 }
 0x2df   :  { %972 = vsyncpa [#allocation3], 1 }

</bundles_post_ra>
